<compile_context>
chip_gen: v6e
topology: v6e:2x2x1
jax: 0.10.0
libtpu: 0.0.40
codegen_flags: <defaults>
</compile_context>

<pallas_src>
import functools

import jax
import jax.numpy as jnp
from jax.experimental import pallas as pl
from jax.experimental.pallas import tpu as pltpu


# VMEM budget for the double-buffered working set (2x input + 2x output block).
# Conservative so kernels also fit v7x's 64 MiB VMEM per TensorCore.
_VMEM_BUDGET = 48 * 1024 * 1024
_VMEM_CAP = 60 * 1024 * 1024


def _vmem_limit(block_bytes):
    return int(min(_VMEM_CAP, max(16 * 2**20, 4 * block_bytes + 4 * 2**20)))


# ---------------------------------------------------------------------------
# Fused kernel: global-average-pool + k-tap channel conv + sigmoid + multiply.
# One batch element per grid step; x block is (1, C, HW) (full trailing dims).
# ---------------------------------------------------------------------------
def _eca_fused_kernel(w_ref, x_ref, o_ref, *, k_size, pad, c, inv_hw):
    xf = x_ref[...].astype(jnp.float32)                 # (1, C, HW)

    # Global average pool, accumulated in f32.
    pooled = jnp.sum(xf, axis=2) * inv_hw               # (1, C)

    # k-tap conv along channels with zero padding:
    #   y[c] = sum_t w[t] * pooled[c + t - pad]
    # zero-pad concat + static lane-shifted slice per tap: a handful of
    # XLU/VPU ops on one lane-vector, no MXU, no (C, C) matrix.
    if pad > 0:
        zpad = jnp.zeros((1, pad), jnp.float32)
        padded = jnp.concatenate([zpad, pooled, zpad], axis=1)   # (1, C + 2*pad)
    else:
        padded = pooled
    y = jnp.zeros((1, c), jnp.float32)
    for t in range(k_size):
        y = y + w_ref[t] * padded[:, t:t + c]            # w_ref[t]: SMEM scalar

    gate = jax.nn.sigmoid(y)                             # (1, C) f32
    # Gate broadcast over the spatial lanes is hoisted -- done exactly once.
    o_ref[...] = (xf * gate[:, :, None]).astype(o_ref.dtype)


# ---------------------------------------------------------------------------
# Two-pass fallback, pass 2: broadcast-multiply x by a precomputed f32 gate.
# Works for both the 3-D channel-tiled and the 4-D H-tiled block layouts.
# ---------------------------------------------------------------------------
def _eca_mul_kernel(x_ref, g_ref, o_ref):
    o_ref[...] = (x_ref[...].astype(jnp.float32) * g_ref[...]).astype(o_ref.dtype)


def eca_attention_pallas(x, conv_w, k_size=3, *, force_mode=None):
    """x: (B, C, H, W).  conv_w: (1, 1, k_size) Conv1d weight (no bias)."""
    b, c, h, w = x.shape
    hw = h * w
    pad = (k_size - 1) // 2
    wk = conv_w.reshape(k_size).astype(jnp.float32)
    itemsize = jnp.dtype(x.dtype).itemsize

    slab_bytes = c * hw * itemsize                       # one (1, C, HW) block
    mode = force_mode
    if mode is None:
        if 4 * slab_bytes <= _VMEM_BUDGET:
            mode = "fused"
        elif 4 * 8 * hw * itemsize <= _VMEM_BUDGET:
            mode = "channel"
        else:
            mode = "spatial"

    # ---------------- Fused single-pass path -------------------------------
    if mode == "fused":
        x_flat = x.reshape(b, c, hw)
        kernel = functools.partial(_eca_fused_kernel, k_size=k_size, pad=pad,
                                   c=c, inv_hw=1.0 / hw)
        out = pl.pallas_call(
            kernel,
            out_shape=jax.ShapeDtypeStruct((b, c, hw), x.dtype),
            grid_spec=pltpu.PrefetchScalarGridSpec(
                num_scalar_prefetch=0,
                grid=(b,),
                in_specs=[
                    # tiny conv taps live in SMEM (cheap scalar reads)
                    pl.BlockSpec(memory_space=pltpu.MemorySpace.SMEM),
                    pl.BlockSpec((1, c, hw), lambda i: (i, 0, 0)),
                ],
                out_specs=pl.BlockSpec((1, c, hw), lambda i: (i, 0, 0)),
            ),
            compiler_params=pltpu.CompilerParams(
                dimension_semantics=("parallel",),
                vmem_limit_bytes=_vmem_limit(slab_bytes)),
        )(wk, x_flat)
        return out.reshape(b, c, h, w)

    # ---------------- Two-pass fallback (slab too large for VMEM) ----------
    # Pass 1: pooled mean + channel conv + sigmoid.  O(B*C) work; left in XLA
    # (tiny fused reduction); costs one extra HBM read of x vs the fused path.
    pooled = jnp.mean(x, axis=(2, 3), dtype=jnp.float32)             # (B, C)
    pp = jnp.pad(pooled, ((0, 0), (pad, pad)))
    y = sum(wk[t] * pp[:, t:t + c] for t in range(k_size))
    gate = jax.nn.sigmoid(y)                                          # (B, C) f32

    if mode == "channel":
        # Pass 2a: multiply tiled over (batch, channel tiles); block keeps the
        # full HW extent on lanes -> no spatial padding ever.
        x_flat = x.reshape(b, c, hw)
        g3 = gate[:, :, None]                                         # (B, C, 1)
        fit = max(8, (_VMEM_BUDGET // (4 * hw * itemsize)) // 8 * 8)
        tc = int(min(c, fit))
        out = pl.pallas_call(
            _eca_mul_kernel,
            out_shape=jax.ShapeDtypeStruct((b, c, hw), x.dtype),
            grid_spec=pltpu.PrefetchScalarGridSpec(
                num_scalar_prefetch=0,
                grid=(b, pl.cdiv(c, tc)),
                in_specs=[
                    pl.BlockSpec((1, tc, hw), lambda i, j: (i, j, 0)),
                    pl.BlockSpec((1, tc, 1), lambda i, j: (i, j, 0)),
                ],
                out_specs=pl.BlockSpec((1, tc, hw), lambda i, j: (i, j, 0)),
            ),
            compiler_params=pltpu.CompilerParams(
                dimension_semantics=("parallel", "parallel"),
                vmem_limit_bytes=_vmem_limit(tc * hw * itemsize)),
        )(x_flat, g3)
        return out.reshape(b, c, h, w)

    # Pass 2b ("spatial"): even a single 8-channel row of HW overflows the
    # budget -> keep the original 4-D layout and tile H instead (W stays the
    # full lane extent, still no padding).
    g4 = gate[:, :, None, None]                                       # (B, C, 1, 1)
    row_bytes = w * itemsize
    fit = max(8, (_VMEM_BUDGET // (4 * row_bytes)) // 8 * 8)
    th = int(min(h, fit))
    out = pl.pallas_call(
        _eca_mul_kernel,
        out_shape=jax.ShapeDtypeStruct((b, c, h, w), x.dtype),
        grid_spec=pltpu.PrefetchScalarGridSpec(
            num_scalar_prefetch=0,
            grid=(b, c, pl.cdiv(h, th)),
            in_specs=[
                pl.BlockSpec((1, 1, th, w), lambda i, j, k: (i, j, k, 0)),
                pl.BlockSpec((1, 1, 1, 1), lambda i, j, k: (i, j, 0, 0)),
            ],
            out_specs=pl.BlockSpec((1, 1, th, w), lambda i, j, k: (i, j, k, 0)),
        ),
        compiler_params=pltpu.CompilerParams(
            dimension_semantics=("parallel", "parallel", "parallel"),
            vmem_limit_bytes=_vmem_limit(th * row_bytes)),
    )(x, g4)
    return out


def eca_attention_ref(x, conv_w, k_size=3):
    """Pure-JAX reference mirroring the PyTorch forward exactly."""
    pooled = jnp.mean(x.astype(jnp.float32), axis=(2, 3))             # (B, C)
    pad = (k_size - 1) // 2
    p = jnp.pad(pooled, ((0, 0), (pad, pad)))
    wk = conv_w.reshape(k_size).astype(jnp.float32)
    y = sum(wk[t] * p[:, t:t + x.shape[1]] for t in range(k_size))    # (B, C)
    gate = jax.nn.sigmoid(y)[:, :, None, None]
    return (x.astype(jnp.float32) * gate).astype(x.dtype)


if __name__ == "__main__":
    key = jax.random.PRNGKey(0)
    kx, kw, kw5 = jax.random.split(key, 3)

    B, C, H, W = 2, 4, 16, 16
    K = 3
    x = jax.random.normal(kx, (B, C, H, W), dtype=jnp.float32)
    conv_w = jax.random.normal(kw, (1, 1, K), dtype=jnp.float32) * 0.5

    ref = eca_attention_ref(x, conv_w, k_size=K)

    # Fused single-pass path.
    out = jax.block_until_ready(eca_attention_pallas(x, conv_w, k_size=K))
    assert out.shape == (B, C, H, W)
    assert jnp.allclose(out, ref, atol=1e-5, rtol=1e-5), "fused path mismatch"

    # Channel-tiled two-pass fallback (forced so it is exercised at small shapes).
    out2 = jax.block_until_ready(
        eca_attention_pallas(x, conv_w, k_size=K, force_mode="channel"))
    assert jnp.allclose(out2, ref, atol=1e-5, rtol=1e-5), "channel path mismatch"

    # H-tiled 4-D two-pass fallback (forced).
    out3 = jax.block_until_ready(
        eca_attention_pallas(x, conv_w, k_size=K, force_mode="spatial"))
    assert jnp.allclose(out3, ref, atol=1e-5, rtol=1e-5), "spatial path mismatch"

    # Non-128-multiple spatial size: fused path with no padding, masked lanes.
    x2 = jax.random.normal(kx, (B, C, 7, 7), dtype=jnp.float32)
    ref2 = eca_attention_ref(x2, conv_w, k_size=K)
    out4 = jax.block_until_ready(eca_attention_pallas(x2, conv_w, k_size=K))
    assert jnp.allclose(out4, ref2, atol=1e-5, rtol=1e-5), "odd-HW path mismatch"

    # Larger conv kernel (k_size=5, pad=2) exercises the multi-tap shift path.
    conv_w5 = jax.random.normal(kw5, (1, 1, 5), dtype=jnp.float32) * 0.5
    ref5 = eca_attention_ref(x, conv_w5, k_size=5)
    out5 = jax.block_until_ready(eca_attention_pallas(x, conv_w5, k_size=5))
    assert jnp.allclose(out5, ref5, atol=1e-5, rtol=1e-5), "k=5 path mismatch"

    print("KERNEL_OK")
</pallas_src>

<mosaic_0001>
module attributes {stable_mosaic.version = 11 : i64} {
  func.func @_eca_fused_kernel(%arg0: i32, %arg1: memref<3xf32, #tpu.memory_space<smem>>, %arg2: memref<1x4x256xf32, #tpu.memory_space<vmem>>, %arg3: memref<1x4x256xf32, #tpu.memory_space<vmem>>) attributes {dimension_semantics = [#tpu.dimension_semantics<parallel>], iteration_bounds = array<i64: 2>, scalar_prefetch = 0 : i64, scratch_operands = 0 : i64, tpu.core_type = #tpu.core_type<tc>, window_params = [{transform_indices = @transform_0, window_bounds = array<i64: 3>}, {transform_indices = @transform_1, window_bounds = array<i64: 1, 4, 256>}, {transform_indices = @transform_2, window_bounds = array<i64: 1, 4, 256>}]} {
    %c0 = arith.constant 0 : index
    %c0_0 = arith.constant 0 : index
    %c0_1 = arith.constant 0 : index
    %0 = vector.load %arg2[%c0, %c0_0, %c0_1] : memref<1x4x256xf32, #tpu.memory_space<vmem>>, vector<1x4x256xf32>
    %cst = arith.constant dense<0.000000e+00> : vector<1x4xf32>
    %1 = vector.multi_reduction <add>, %0, %cst [2] : vector<1x4x256xf32> to vector<1x4xf32>
    %cst_2 = arith.constant 3.906250e-03 : f32
    %2 = vector.broadcast %cst_2 : f32 to vector<1x4xf32>
    %3 = arith.mulf %1, %2 : vector<1x4xf32>
    %cst_3 = arith.constant 0.000000e+00 : f32
    %4 = vector.broadcast %cst_3 : f32 to vector<1x1xf32>
    %5 = tpu.concatenate %4, %3, %4 in 1 : vector<1x1xf32>, vector<1x4xf32>, vector<1x1xf32> -> vector<1x6xf32>
    %cst_4 = arith.constant 0.000000e+00 : f32
    %6 = vector.broadcast %cst_4 : f32 to vector<1x4xf32>
    %c0_5 = arith.constant 0 : index
    %7 = memref.load %arg1[%c0_5] : memref<3xf32, #tpu.memory_space<smem>>
    %8 = vector.extract_strided_slice %5 {offsets = [0, 0], sizes = [1, 4], strides = [1, 1]} : vector<1x6xf32> to vector<1x4xf32>
    %9 = vector.broadcast %7 : f32 to vector<1x4xf32>
    %10 = arith.mulf %9, %8 : vector<1x4xf32>
    %11 = arith.addf %6, %10 : vector<1x4xf32>
    %c1 = arith.constant 1 : index
    %12 = memref.load %arg1[%c1] : memref<3xf32, #tpu.memory_space<smem>>
    %13 = vector.extract_strided_slice %5 {offsets = [0, 1], sizes = [1, 4], strides = [1, 1]} : vector<1x6xf32> to vector<1x4xf32>
    %14 = vector.broadcast %12 : f32 to vector<1x4xf32>
    %15 = arith.mulf %14, %13 : vector<1x4xf32>
    %16 = arith.addf %11, %15 : vector<1x4xf32>
    %c2 = arith.constant 2 : index
    %17 = memref.load %arg1[%c2] : memref<3xf32, #tpu.memory_space<smem>>
    %18 = vector.extract_strided_slice %5 {offsets = [0, 2], sizes = [1, 4], strides = [1, 1]} : vector<1x6xf32> to vector<1x4xf32>
    %19 = vector.broadcast %17 : f32 to vector<1x4xf32>
    %20 = arith.mulf %19, %18 : vector<1x4xf32>
    %21 = arith.addf %16, %20 : vector<1x4xf32>
    %22 = arith.negf %21 : vector<1x4xf32>
    %23 = math.exp %22 : vector<1x4xf32>
    %cst_6 = arith.constant 1.000000e+00 : f32
    %24 = vector.broadcast %cst_6 : f32 to vector<1x4xf32>
    %25 = arith.addf %24, %23 : vector<1x4xf32>
    %26 = arith.divf %24, %25 : vector<1x4xf32>
    %27 = vector.shape_cast %26 : vector<1x4xf32> to vector<1x4x1xf32>
    %28 = vector.broadcast %27 : vector<1x4x1xf32> to vector<1x4x256xf32>
    %29 = arith.mulf %0, %28 : vector<1x4x256xf32>
    %c0_7 = arith.constant 0 : index
    %c0_8 = arith.constant 0 : index
    %c0_9 = arith.constant 0 : index
    %30 = vector.load %arg3[%c0_7, %c0_8, %c0_9] : memref<1x4x256xf32, #tpu.memory_space<vmem>>, vector<1x4x256xf32>
    tpu.vector_store %arg3[%c0_7, %c0_8, %c0_9], %29 {strides = array<i32>} : memref<1x4x256xf32, #tpu.memory_space<vmem>>, vector<1x4x256xf32>,
    return
  }
  func.func @transform_0(%arg0: i32) -> i32 {
    %c0_i32 = arith.constant 0 : i32
    %c0_i32_0 = arith.constant 0 : i32
    return %c0_i32 : i32
  }
  func.func @transform_1(%arg0: i32) -> (i32, i32, i32) {
    %c0_i32 = arith.constant 0 : i32
    %c0_i32_0 = arith.constant 0 : i32
    %c0_i32_1 = arith.constant 0 : i32
    return %arg0, %c0_i32, %c0_i32_0 : i32, i32, i32
  }
  func.func @transform_2(%arg0: i32) -> (i32, i32, i32) {
    %c0_i32 = arith.constant 0 : i32
    %c0_i32_0 = arith.constant 0 : i32
    %c0_i32_1 = arith.constant 0 : i32
    return %arg0, %c0_i32, %c0_i32_0 : i32, i32, i32
  }
}

</mosaic_0001>

<bundles_post_ra>
// kernel: tpu_custom_call.1
= control target key start
LH: loop header
LB: loop body
LE: loop exit
PB: predicated region body
PF: predicated region fallthrough
CT: control target
= control target key end

     0   :  { %7 = vsyncpa [#allocation5], 0  ;;  %s703_s0 = inlined_call_operand.hbm [shape: f32[3], index: 0, kind: input, shape index: {}]   ;;  %s704_s1 = inlined_call_operand.hbm [shape: f32[2,4,256], index: 1, kind: input, shape index: {}]   ;;  %s705_s2 = inlined_call_operand.hbm [shape: f32[2,4,256], index: 2, kind: output, shape index: {}]  }
   0x1   :  { %8 = vsyncpa [#allocation3], 0 }
   0x2   :  { %10 = vsyncpa [#allocation3 + $0x1], 0 }
   0x3   :  { %11 = vsyncpa [#allocation4], 0 }
   0x4   :  { %13 = vsyncpa [#allocation4 + $0x1], 0  ;;  %s553_s9 = smov 0   ;;  %s555_s10 = smov 0  }
   0x5   :  { %s557_s11 = smov 0   ;;  %s559_s12 = smov 0  }
   0x6 LB: > { %s574_s13 = sadd.s32 4294967295, %s530_s12   ;;  %s337_s14 = sadd.s32 4294967294, %s530_s12   ;;  %s530_s12 = sphi %s559_s12, %s725_s12   ;;  %s526_s11 = sphi %s557_s11, %s724_s11   ;;  %s522_s10 = sphi %s555_s10, %s723_s10   ;;  %s518_s9 = sphi %s553_s9, %s722_s9  }
   0x7   : > { %p60_p0 = scmp.ne.s32.totalorder %s522_s10, %s518_s9  ;;  %p706_p1 = scmp.eq.s32.totalorder %s574_s13, 0 }
   0x8   : > { %p84_p2 = scmp.eq.s32.totalorder %s574_s13, 1  ;;  %p90_p3 = scmp.eq.s32.totalorder %s337_s14, 1 }
   0x9   : > { %p583_p4 = por %p706_p1, %p60_p0  ;;  %p338_p5 = scmp.ge.s32.totalorder %s530_s12, 1 }
   0xa   : > { %p588_p6 = por %p90_p3, %p60_p0  ;;  %p97_p7 = scmp.lt.s32.totalorder %s530_s12, 3 }
   0xb   : > { %s710_s15 = scalar_select %p583_p4, 1, 0 }
   0xc   : > { %s711_s16 = scalar_select %p588_p6, 1, 0 }
   0xd   : > { %p593_p8 = pnand %p338_p5, %p97_p7  ;;  %s599_s18 = sadd.s32 1, %s530_s12  }
   0xe   : > { %s44_s19 = ssub.s32 %s530_s12, %s599_s18  ;;  %s47_s20 = sadd.s32 1, %s526_s11 }
   0xf   : > { %s712_s17 = scalar_select %p593_p8, 1, 0 }
  0x10   : > { %p366_p10 = pneg %p593_p8  ;;  %p45_p12 = scmp.eq.s32.totalorder %s44_s19, 0 }
  0x11   : > { %p54_p13 = scmp.ne.s32.totalorder %s526_s11, %s522_s10  ;;  %p55_p0 = scmp.eq.s32.totalorder %s530_s12, 0 }
  0x12   : > { %p367_p11 = pnand %p366_p10, %p706_p1  ;;  %p379_p3 = scmp.lt.s32.totalorder %s530_s12, 2 }
  0x13   : > { %s532_s21 = smov [#allocation2]   ;;  %p56_p5 = por %p55_p0, %p54_p13 }
  0x14   : > { %369 = dma.hbm_to_smem (!%p367_p11), %s703_s0, 16, %s532_s21, [#allocation5]  }
  0x15   : > { %s616_s24 = scalar_select %p45_p12, %s526_s11, %s47_s20  }
  0x16   : > { %p620_p7 = por %p84_p2, %p54_p13  ;;  %s119_s26 = sand.u32 1, %s526_s11  }
  0x17   : > { %s356_s27 = sshll.u32 %s530_s12, 7  ;;  %s341_s28 = sshll.u32 %s119_s26, 3 }
  0x18   : > { %s713_s25 = scalar_select %p620_p7, 1, 0 }
  0x19   : > { %s629_s3 = scalar_lea.hbm %s704_s1, %s356_s27  ;;  %s123_s4 = scalar_lea.vmem [#allocation6], %s341_s28 }
  0x1a   : > { %s131_s5 = sshll.u32 %s123_s4, 4  ;;  %p631_p10 = pnand %p379_p3, %p56_p5  ;;  %s132_s5 = int_to_ptr.vmem [resolvable:$true] %s131_s5 }
  0x1b   : > { %s120_s7 = scalar_lea.sflag [#allocation3], %s119_s26  ;;  %s434_s8 = scalar_lea.hbm %s629_s3, 128 }
  0x1c   : > { %p435_p2 = scmp.ne.s32.totalorder %s629_s3, %s434_s8  ;;  %p436_p11 = pneg %p631_p10 }
  0x1d   : > { %s439_s20 = scalar_lea.hbm %s704_s1, 256  ;;  %p440_p0 = scmp.lt.s32.totalorder %s629_s3, %s704_s1 }
  0x1e   : > { %p437_p12 = pnand %p436_p11, %p435_p2  ;;  %p441_p3 = scmp.lt.s32.totalorder %s439_s20, %s434_s8 }
  0x20   : > { %p438_p13 = pneg %p437_p12  ;;  %p442_p5 = por %p441_p3, %p440_p0 }
  0x22   : > { %p443_p9 = pnand %p442_p5, %p438_p13 }
  0x24   : > { %446 = shalt.err (!%p443_p9)
}
  0x25   : > { %s447_s23 = scalar_lea.vmem %s132_s5, 128  ;;  %s533_s26 = smov [#allocation6]  }
  0x26   : > { %p448_p1 = scmp.ne.s32.totalorder %s132_s5, %s447_s23  ;;  %s452_s27 = sshll.u32 %s533_s26, 4  ;;  %s453_s27 = int_to_ptr.vmem [resolvable:$false] %s452_s27 }
  0x27   : > { %s454_s28 = scalar_lea.vmem %s453_s27, 256  ;;  %p455_p2 = scmp.lt.s32.totalorder %s132_s5, %s453_s27 }
  0x28   : > { %p450_p6 = pnand %p448_p1, %p436_p11  ;;  %p456_p12 = scmp.lt.s32.totalorder %s454_s28, %s447_s23 }
  0x2a   : > { %p451_p7 = pneg %p450_p6  ;;  %p457_p4 = por %p456_p12, %p455_p2 }
  0x2c   : > { %p458_p8 = pnand %p457_p4, %p451_p7 }
  0x2e   : > { %461 = shalt.err (!%p458_p8)
}
  0x2f   : > { %373 = dma.hbm_to_vmem [thread:$0]  (!%p631_p10), %s629_s3, 128, %s132_s5, %s120_s7  }
  0x30   : > { %p715_p13 = scmp.ne.s32.totalorder %s712_s17, 0 }
  0x31   : > { %p716_p9 = scmp.eq.s32.totalorder (!%p715_p13), %s574_s13, 0 }
  0x32   : > { %140 = sbr.rel (%p715_p13) target bundleno = 499 (0x1f3), region = 28 }
  0x37   : > { %505 = dma.done.wait (%p716_p9), [#allocation5], 16   ;;  %p717_p1 = pmov %p716_p9 }
  0x38   : > { %s656_s29 = sand.u32 1, %s522_s10   ;;  %p718_p4 = scmp.ne.s32.totalorder %s710_s15, 0 }
  0x39   : > { %507 = vsyncadd (%p717_p1), [#allocation5], 4294967280  ;;  %s346_s30 = sshll.u32 %s656_s29, 3  ;;  %s147_s4 = scalar_lea.sflag [#allocation3], %s656_s29 }
  0x3a   : > { %s150_s3 = scalar_lea.vmem [#allocation6], %s346_s30 }
  0x3b   : > { %509 = dma.done.wait (%p718_p4), %s147_s4, 128  }
  0x3c   : > { %511 = vsyncadd (%p718_p4), %s147_s4, 4294967168 }
  0x3d   : > { %155 = sfence }
  0x3e   : > { %v172_v0 = vld [vmem:[%s150_s3] sm:$0xff]  ;;  %vm176_vm0 = vcmask 1043456   ;;  %v184_v5 = vlaneseq  ;;  %s349_s17 = sld [smem:[#allocation2 + $0x2]]  ;;  %vm192_vm1 = vcmask 7168   ;;  %vm194_vm2 = vcmask 39936   ;;  %s534_s15 = smov 126  }
  0x3f   : > { %v174_v1 = vcombine.high %v172_v0, %v172_v0  ;;  %v177_v2 = vsel %vm176_vm0, %v172_v0, 0.0  ;;  %s348_s5 = sld [smem:[#allocation2 + $0x1]]  ;;  %s535_s6 = smov 127   ;;  %v536_v31 = vmov 839922192  }
  0x40   : > { %v185_v6 = vand.u32 127, %v184_v5  ;;  %v188_v8 = vshrl.u32 %v184_v5, 7  ;;  %s196_s7 = sld [smem:[#allocation2]]  ;;  %v231_v32 = vunpack.c.l.s4 %v536_v31  ;;  %s357_s8 = sshll.u32 %s574_s13, 7 }
  0x41   : > { %v178_v3 = vsel %vm176_vm0, %v174_v1, 0.0  ;;  %s171_s14 = scalar_lea.vmem [#allocation7], %s346_s30  ;;  %s253_s22 = scalar_lea.hbm %s705_s2, %s357_s8 }
  0x42   : > { %v179_v4 = vadd.f32 %v178_v3, %v177_v2  ;;  %v186_v7 = vadd.s32 4294967295, %v185_v6  ;;  %v224_v28 = vsub.s32 0, %v188_v8  ;;  %v232_v33 = vunpack.c.0.s8 %v231_v32  ;;  %s255_s19 = sshll.u32 %s171_s14, 4  ;;  %s241_s23 = scalar_lea.sflag [#allocation4], %s656_s29  ;;  %s256_s19 = int_to_ptr.vmem [resolvable:$true] %s255_s19 }
  0x43   : > { %s462_s26 = scalar_lea.vmem %s256_s19, 128  ;;  %p719_p8 = scmp.ne.s32.totalorder %s713_s25, 0 }
  0x44   : > { %180 = vadd.xlane.f32.xlu0 %v179_v4  ;;  %v189_v9 = vsub.s32 %v186_v7, %v188_v8  ;;  %v209_v13 = vstv %s349_s17  ;;  %v235_v34 = vsub.s32 %v232_v33, %v188_v8  ;;  %p463_p6 = scmp.ne.s32.totalorder %s256_s19, %s462_s26  ;;  %s537_s27 = smov [#allocation7]  }
  0x45   : > { %v201_v14 = vstv %s348_s5  ;;  %s466_s28 = sshll.u32 %s537_s27, 4  ;;  %s467_s28 = int_to_ptr.vmem [resolvable:$false] %s466_s28 }
  0x46   : > { %v197_v19 = vstv %s196_s7  ;;  %p464_p7 = pnand %p463_p6, %p719_p8  ;;  %s468_s13 = scalar_lea.vmem %s467_s28, 256 }
  0x47   : > { %p469_p11 = scmp.lt.s32.totalorder %s256_s19, %s467_s28  ;;  %p470_p0 = scmp.lt.s32.totalorder %s468_s13, %s462_s26 }
  0x48   : > { %p465_p10 = pneg %p464_p7 }
  0x49   : > { %p471_p3 = por %p470_p0, %p469_p11 }
  0x4b   : > { %p472_p5 = pnand %p471_p3, %p465_p10 }
  0xcd   : > { %v181_v10 = vpop.xlane.xlu0 %180 }
  0xce   : > { %v182_v11 = vmul.f32 0.00390625, %v181_v10 }
  0xd0   : > { %v190_v12 = vrot.slane %v182_v11, %v189_v9 }
  0xd2   : > { %v193_v15 = vsel %vm192_vm1, 0.0, %v190_v12 }
  0xd3   : > { %v195_v16 = vsel %vm194_vm2, %v193_v15, 0.0 }
  0xd4   : > { %v210_v17 = vmul.f32 %v209_v13, %v195_v16  ;;  %v202_v18 = vmul.f32 %v201_v14, %v195_v16  ;;  %v198_v20 = vmul.f32 %v197_v19, %v195_v16 }
  0xd6   : > { %212 = vrot.lane.b32.xlu1 %v210_v17, %s534_s15  ;;  %204 = vrot.lane.b32.xlu0 %v202_v18, %s535_s6 }
 0x148   : > { %v205_v21 = vpop.permute.xlu0 %204  ;;  %v213_v23 = vpop.permute.xlu1 %212 }
 0x149   : > { %v207_v22 = vadd.f32 %v205_v21, %v198_v20 }
 0x14b   : > { %v215_v24 = vadd.f32 %v213_v23, %v207_v22 }
 0x14d   : > { %v350_v25 = vmul.f32 -1.442695, %v215_v24 }
 0x14f   : > { %419 = vpow2.f32 %v350_v25 }
 0x15c   : > { %v420_v26 = vpop.eup %419 }
 0x15d   : > { %v219_v27 = vadd.f32 1.0, %v420_v26 }
 0x15f   : > { %421 = vrcp.f32 %v219_v27 }
 0x16c   : > { %v422_v29 = vpop.eup %421 }
 0x16d   : > { %v225_v30 = vrot.slane %v422_v29, %v224_v28 }
 0x16f   : > { %227 = vbcast.lane.b32.xlu1 %v225_v30, 256 }
 0x1e1   : > { %v228_v35 = vpop.permute.xlu1 %227 }
 0x1e2   : > { %v236_v36 = vrot.slane %v228_v35, %v235_v34 }
 0x1e4   : > { %v238_v37 = vmul.f32 %v236_v36, %v172_v0 }
 0x1e6   : > { %239 = vst [vmem:[%s171_s14] sm:$0xff] %v238_v37 }
 0x1e7   : > { %475 = shalt.err (!%p472_p5)
}
 0x1e8   : > { %s476_s30 = scalar_lea.hbm %s253_s22, 128  ;;  %s480_s3 = scalar_lea.hbm %s705_s2, 256 }
 0x1e9   : > { %p477_p2 = scmp.ne.s32.totalorder %s253_s22, %s476_s30  ;;  %p481_p9 = scmp.lt.s32.totalorder %s253_s22, %s705_s2 }
 0x1ea   : > { %p482_p1 = scmp.lt.s32.totalorder %s480_s3, %s476_s30 }
 0x1eb   : > { %p478_p12 = pnand %p477_p2, %p719_p8 }
 0x1ec   : > { %p483_p4 = por %p482_p1, %p481_p9 }
 0x1ed   : > { %p479_p13 = pneg %p478_p12 }
 0x1ef   : > { %p484_p6 = pnand %p483_p4, %p479_p13 }
 0x1f1   : > { %487 = shalt.err (!%p484_p6)
}
 0x1f2   : > { %364 = dma.vmem_to_hbm [thread:$0]  (%p719_p8), %s256_s19, 128, %s253_s22, %s241_s23  }
 0x1f3 PF: > { %s267_s15 = sand.u32 1, %s518_s9   ;;  %p720_p7 = scmp.ne.s32.totalorder %s711_s16, 0 }
 0x1f4   : > { %p721_p10 = scmp.ge.s32.totalorder %s530_s12, 2  ;;  %s268_s6 = scalar_lea.sflag [#allocation4], %s267_s15 }
 0x1f6   : > { %p375_p11 = pnand %p721_p10, %p720_p7 }
 0x1f8   : > { %p376_p0 = pneg %p375_p11 }
 0x1fa   : > { %513 = dma.done.wait (%p376_p0), %s268_s6, 128  }
 0x1fb   : > { %515 = vsyncadd (%p376_p0), %s268_s6, 4294967168  ;;  %p16_p3 = scmp.ge.s32.totalorder %s599_s18, 4   ;;  %s722_s9 = smov %s522_s10 }
 0x1fc   : > { %s723_s10 = smov %s526_s11  ;;  %s724_s11 = smov %s616_s24 }
 0x1fd   : > { %s725_s12 = smov %s599_s18  ;;  %18 = sbr.rel (!%p16_p3) target bundleno = 6 (0x6), region = 78 }
 0x202   :  { %273 = vsyncpa [#allocation3], 1 }
 0x203   :  { %275 = vsyncpa [#allocation3 + $0x1], 1 }
 0x204   :  { %276 = vsyncpa [#allocation4], 1 }
 0x205   :  { %278 = vsyncpa [#allocation4 + $0x1], 1 }
 0x206   :  { %279 = vsyncpa [#allocation5], 1 }
 0x207   :  { %281 = vsyncpa [#allocation5 + $0x1], 1 }

</bundles_post_ra>
